<compile_context>
chip_gen: v6e
topology: v6e:2x2x1
jax: 0.10.0
libtpu: 0.0.40
codegen_flags: <defaults>
</compile_context>

<pallas_src>
import functools

import jax
import jax.numpy as jnp
from jax import lax
from jax.experimental import pallas as pl
from jax.experimental.pallas import tpu as pltpu

# ---------------------------------------------------------------------------
# Problem sizes (small, consistent with the module's forward signature)
# ---------------------------------------------------------------------------
B = 2            # batch
H = 8            # spatial height
W = 8            # spatial width
N = H * W        # tokens per image
BN = B * N       # 128 tokens total -> full 128-lane width
C = 32           # token channels
HIDDEN = 64      # decoder hidden width
NUM_CLASSES = 16 # output classes


# ---------------------------------------------------------------------------
# Pallas kernel: fused Linear -> GELU -> Linear.
# Inputs (all resident in VMEM, single invocation, no grid):
#   x2d  : (BN, C)                 tokens row-major, channels on lanes
#   w1t  : (HIDDEN, C)             first-layer weight, transposed
#   w2t  : (K, HIDDEN)             second-layer weight, transposed
#   bias : (HIDDEN + K, 1)         [b1 ; b2] as lane-broadcast columns
# Output:
#   out  : (B, K, N)               per-batch class-major logits (NCHW after a
#                                  free reshape in the wrapper)
# The matmuls are computed "transposed" (channels on sublanes, the 128 tokens on
# lanes) so both MXU results are 128-lane dense; only the final per-batch stores
# are 64 lanes wide, which is negligible at (16, 64) f32.
# ---------------------------------------------------------------------------
def decoder_kernel(x2d_ref, w1t_ref, w2t_ref, bias_ref, out_ref, *, batch, tokens):
    b1 = bias_ref[:HIDDEN, :]                                  # (HIDDEN, 1)
    b2 = bias_ref[HIDDEN:, :]                                  # (K, 1)

    # (HIDDEN, C) x (BN, C) contracted on C -> (HIDDEN, BN); tokens stay on lanes.
    ht = lax.dot_general(
        w1t_ref[...], x2d_ref[...],
        dimension_numbers=(((1,), (1,)), ((), ())),
        preferred_element_type=jnp.float32)
    ht = jax.nn.gelu(ht + b1)                                  # tanh approx (EUP-native)

    # (K, HIDDEN) @ (HIDDEN, BN) -> (K, BN)
    ot = jnp.dot(w2t_ref[...], ht, preferred_element_type=jnp.float32)
    ot = ot + b2

    # Fold the class<->batch transpose into the store: (K, BN) -> (B, K, N).
    for bi in range(batch):                                    # batch is tiny & static
        out_ref[bi, :, :] = ot[:, bi * tokens:(bi + 1) * tokens].astype(out_ref.dtype)


def decoder_pallas(x2d, w1t, w2t, bias, batch, tokens):
    """x2d: (B*N, C) tokens -> logits (B, NUM_CLASSES, N)."""
    bn, c = x2d.shape
    k_out, hidden = w2t.shape
    cost = pl.CostEstimate(
        flops=2 * bn * c * hidden + 2 * bn * hidden * k_out,
        transcendentals=bn * hidden,
        bytes_accessed=4 * (x2d.size + w1t.size + w2t.size + bias.size
                            + batch * k_out * tokens),
    )
    vmem = pl.BlockSpec(memory_space=pltpu.MemorySpace.VMEM)
    return pl.pallas_call(
        functools.partial(decoder_kernel, batch=batch, tokens=tokens),
        out_shape=jax.ShapeDtypeStruct((batch, k_out, tokens), jnp.float32),
        in_specs=[vmem, vmem, vmem, vmem],                     # whole arrays, VMEM-resident
        out_specs=vmem,
        cost_estimate=cost,
    )(x2d, w1t, w2t, bias)


# ---------------------------------------------------------------------------
# Cla_model forward: x_cla = decoder(x_inter, H, W)
# ---------------------------------------------------------------------------
def cla_model_forward(x_inter, height, width, params):
    """x_inter: (B, N, C) tokens; returns (B, NUM_CLASSES, height, width) NCHW."""
    b, n, c = x_inter.shape
    assert n == height * width
    x2d = x_inter.reshape(b * n, c)                            # free, contiguous
    out = decoder_pallas(x2d, params["w1t"], params["w2t"], params["bias"], b, n)
    return out.reshape(b, NUM_CLASSES, height, width)          # free, contiguous


def init_params(key):
    k1, k2, k3, k4 = jax.random.split(key, 4)
    w1 = jax.random.normal(k1, (C, HIDDEN), jnp.float32) * 0.05
    b1 = jax.random.normal(k2, (HIDDEN,), jnp.float32) * 0.01
    w2 = jax.random.normal(k3, (HIDDEN, NUM_CLASSES), jnp.float32) * 0.05
    b2 = jax.random.normal(k4, (NUM_CLASSES,), jnp.float32) * 0.01
    return {
        # kernel-side layouts (one-time layout cost at init)
        "w1t": w1.T,                                           # (HIDDEN, C)
        "w2t": w2.T,                                           # (K, HIDDEN)
        "bias": jnp.concatenate([b1, b2]).reshape(HIDDEN + NUM_CLASSES, 1),
        # originals kept for the pure-JAX reference
        "w1": w1, "b1": b1, "w2": w2, "b2": b2,
    }


def reference_forward(x_inter, height, width, params):
    b, n, c = x_inter.shape
    x = x_inter.reshape(b * n, c)
    h = jax.nn.gelu(x @ params["w1"] + params["b1"])
    o = h @ params["w2"] + params["b2"]
    return o.reshape(b, height, width, NUM_CLASSES).transpose(0, 3, 1, 2)


if __name__ == "__main__":
    key = jax.random.PRNGKey(0)
    k_in, k_p = jax.random.split(key)
    x_inter = jax.random.normal(k_in, (B, N, C), jnp.float32)
    params = init_params(k_p)

    out = cla_model_forward(x_inter, H, W, params)
    out = jax.block_until_ready(out)

    ref = reference_forward(x_inter, H, W, params)
    assert out.shape == (B, NUM_CLASSES, H, W), out.shape
    assert jnp.allclose(out, ref, atol=1e-4, rtol=1e-4), "mismatch vs JAX reference"

    print("KERNEL_OK")
</pallas_src>

<mosaic_0001>
module attributes {stable_mosaic.version = 11 : i64} {
  func.func @decoder_kernel(%arg0: memref<128x32xf32, #tpu.memory_space<vmem>>, %arg1: memref<64x32xf32, #tpu.memory_space<vmem>>, %arg2: memref<16x64xf32, #tpu.memory_space<vmem>>, %arg3: memref<80x1xf32, #tpu.memory_space<vmem>>, %arg4: memref<2x16x64xf32, #tpu.memory_space<vmem>>) attributes {dimension_semantics = [], scalar_prefetch = 0 : i64, scratch_operands = 0 : i64, tpu.core_type = #tpu.core_type<tc>} {
    %c0 = arith.constant 0 : index
    %c0_0 = arith.constant 0 : index
    %0 = vector.load %arg3[%c0, %c0_0] : memref<80x1xf32, #tpu.memory_space<vmem>>, vector<64x1xf32>
    %c64 = arith.constant 64 : index
    %c0_1 = arith.constant 0 : index
    %1 = vector.load %arg3[%c64, %c0_1] : memref<80x1xf32, #tpu.memory_space<vmem>>, vector<16x1xf32>
    %c0_2 = arith.constant 0 : index
    %c0_3 = arith.constant 0 : index
    %2 = vector.load %arg1[%c0_2, %c0_3] : memref<64x32xf32, #tpu.memory_space<vmem>>, vector<64x32xf32>
    %c0_4 = arith.constant 0 : index
    %c0_5 = arith.constant 0 : index
    %3 = vector.load %arg0[%c0_4, %c0_5] : memref<128x32xf32, #tpu.memory_space<vmem>>, vector<128x32xf32>
    %cst = arith.constant dense<0.000000e+00> : vector<64x128xf32>
    %4 = tpu.matmul %2, %3, %cst {dimension_numbers = #tpu.dot_dimension_numbers<[1], [1], [0], [0], [0, 0, 1, 0], [], []>} : vector<64x32xf32>, vector<128x32xf32>, vector<64x128xf32> -> vector<64x128xf32>
    %5 = vector.broadcast %0 : vector<64x1xf32> to vector<64x128xf32>
    %6 = arith.addf %4, %5 : vector<64x128xf32>
    %7 = arith.mulf %6, %6 : vector<64x128xf32>
    %8 = arith.mulf %6, %7 : vector<64x128xf32>
    %cst_6 = arith.constant 4.471500e-02 : f32
    %9 = vector.broadcast %cst_6 : f32 to vector<64x128xf32>
    %10 = arith.mulf %9, %8 : vector<64x128xf32>
    %11 = arith.addf %6, %10 : vector<64x128xf32>
    %cst_7 = arith.constant 0.797884583 : f32
    %12 = vector.broadcast %cst_7 : f32 to vector<64x128xf32>
    %13 = arith.mulf %12, %11 : vector<64x128xf32>
    %14 = math.tanh %13 : vector<64x128xf32>
    %cst_8 = arith.constant 1.000000e+00 : f32
    %15 = vector.broadcast %cst_8 : f32 to vector<64x128xf32>
    %16 = arith.addf %15, %14 : vector<64x128xf32>
    %cst_9 = arith.constant 5.000000e-01 : f32
    %17 = vector.broadcast %cst_9 : f32 to vector<64x128xf32>
    %18 = arith.mulf %17, %16 : vector<64x128xf32>
    %19 = arith.mulf %6, %18 : vector<64x128xf32>
    %c0_10 = arith.constant 0 : index
    %c0_11 = arith.constant 0 : index
    %20 = vector.load %arg2[%c0_10, %c0_11] : memref<16x64xf32, #tpu.memory_space<vmem>>, vector<16x64xf32>
    %cst_12 = arith.constant dense<0.000000e+00> : vector<16x128xf32>
    %21 = tpu.matmul %20, %19, %cst_12 {dimension_numbers = #tpu.dot_dimension_numbers<[1], [0], [0], [1], [0, 0, 1, 1], [], []>} : vector<16x64xf32>, vector<64x128xf32>, vector<16x128xf32> -> vector<16x128xf32>
    %22 = vector.broadcast %1 : vector<16x1xf32> to vector<16x128xf32>
    %23 = arith.addf %21, %22 : vector<16x128xf32>
    %24 = vector.extract_strided_slice %23 {offsets = [0, 0], sizes = [16, 64], strides = [1, 1]} : vector<16x128xf32> to vector<16x64xf32>
    %c0_13 = arith.constant 0 : index
    %c0_14 = arith.constant 0 : index
    %c0_15 = arith.constant 0 : index
    %25 = vector.load %arg4[%c0_13, %c0_14, %c0_15] : memref<2x16x64xf32, #tpu.memory_space<vmem>>, vector<1x16x64xf32>
    %26 = vector.shape_cast %25 : vector<1x16x64xf32> to vector<16x64xf32>
    %27 = vector.shape_cast %24 : vector<16x64xf32> to vector<1x16x64xf32>
    tpu.vector_store %arg4[%c0_13, %c0_14, %c0_15], %27 {strides = array<i32>} : memref<2x16x64xf32, #tpu.memory_space<vmem>>, vector<1x16x64xf32>,
    %28 = vector.extract_strided_slice %23 {offsets = [0, 64], sizes = [16, 64], strides = [1, 1]} : vector<16x128xf32> to vector<16x64xf32>
    %c1 = arith.constant 1 : index
    %c0_16 = arith.constant 0 : index
    %c0_17 = arith.constant 0 : index
    %29 = vector.load %arg4[%c1, %c0_16, %c0_17] : memref<2x16x64xf32, #tpu.memory_space<vmem>>, vector<1x16x64xf32>
    %30 = vector.shape_cast %29 : vector<1x16x64xf32> to vector<16x64xf32>
    %31 = vector.shape_cast %28 : vector<16x64xf32> to vector<1x16x64xf32>
    tpu.vector_store %arg4[%c1, %c0_16, %c0_17], %31 {strides = array<i32>} : memref<2x16x64xf32, #tpu.memory_space<vmem>>, vector<1x16x64xf32>,
    return
  }
}

</mosaic_0001>

<bundles_post_ra>
// kernel: tpu_custom_call.1
= control target key start
LH: loop header
LB: loop body
LE: loop exit
PB: predicated region body
PF: predicated region fallthrough
CT: control target
= control target key end

     0   :  { %vm92_vm0 = vcmask 261120   ;;  %v633_v2 = vmov 0   ;;  %s862_s0 = inlined_call_operand.vmem [shape: f32[128,32], index: 0, kind: input, shape index: {}]   ;;  %s863_s1 = inlined_call_operand.vmem [shape: f32[64,32], index: 1, kind: input, shape index: {}]   ;;  %s864_s2 = inlined_call_operand.vmem [shape: f32[16,64], index: 2, kind: input, shape index: {}]   ;;  %s865_s3 = inlined_call_operand.vmem [shape: f32[80,1], index: 3, kind: input, shape index: {}]   ;;  %s866_s4 = inlined_call_operand.hbm [shape: f32[2,16,64], index: 4, kind: output, shape index: {}]  }
   0x1   :  { %v51_v0 = vld [vmem:[%s862_s0 + $0x78] sm:$0xff]  ;;  %v50_v1 = vld [vmem:[%s862_s0 + $0x70] sm:$0xff]  ;;  %593 = vset.pattern.permute.xlu0 %v633_v2  ;;  %594 = vset.pattern.permute.xlu1 %v633_v2  ;;  %v49_v3 = vld [vmem:[%s862_s0 + $0x68] sm:$0xff] }
   0x2   :  { %525 = vmatprep.subr.msk.mxu0 %vm92_vm0, %v51_v0  ;;  %v28_v4 = vld [vmem:[%s863_s1] sm:$0xff]  ;;  %v25_v6 = vld [vmem:[%s865_s3 + $0x38] sm:$0xff]  ;;  %v23_v7 = vld [vmem:[%s865_s3 + $0x28] sm:$0xff] }
   0x3   :  { %526 = vmatpush3.xpose.msk.msra.mxu0 %vm92_vm0, %v51_v0  ;;  %557 = vmatprep.mubr.msk.f32.mxu0 %vm92_vm0, %v28_v4  ;;  %v48_v5 = vld [vmem:[%s862_s0 + $0x60] sm:$0xff]  ;;  %v24_v8 = vld [vmem:[%s865_s3 + $0x30] sm:$0xff] }
   0x4   :  { %527 = vmatprep.subr.msk.mxu0 %vm92_vm0, %v50_v1  ;;  %89 = vperm.xlu0 %593, %v25_v6   ;;  %v22_v9 = vld [vmem:[%s865_s3 + $0x20] sm:$0xff] }
   0x5   :  { %79 = vperm.xlu1 %594, %v23_v7  }
   0x7   :  { %528 = vmatpush3.xpose.msk.msra.mxu0 %vm92_vm0, %v50_v1 }
   0x8   :  { %529 = vmatprep.subr.msk.mxu0 %vm92_vm0, %v49_v3 }
   0xb   :  { %530 = vmatpush3.xpose.msk.msra.mxu0 %vm92_vm0, %v49_v3 }
   0xc   :  { %531 = vmatprep.subr.msk.mxu0 %vm92_vm0, %v48_v5 }
   0xd   :  { %9 = vsyncpa [#allocation3], 0  ;;  %v47_v10 = vld [vmem:[%s862_s0 + $0x58] sm:$0xff]  ;;  %84 = vperm.xlu0 %593, %v24_v8   ;;  %74 = vperm.xlu1 %594, %v22_v9   ;;  %v20_v12 = vld [vmem:[%s865_s3 + $0x10] sm:$0xff]  ;;  %vm354_vm1 = vcmask 523264   ;;  %s634_s5 = smov 64  }
   0xe   :  { %v21_v11 = vld [vmem:[%s865_s3 + $0x18] sm:$0xff]  ;;  %v46_v13 = vld [vmem:[%s862_s0 + $0x50] sm:$0xff]  ;;  %v19_v14 = vld [vmem:[%s865_s3 + $0x8] sm:$0xff]  ;;  %s635_s6 = smov [#allocation2]  }
   0xf   :  { %532 = vmatpush3.xpose.msk.msra.mxu0 %vm92_vm0, %v48_v5  ;;  %v18_v15 = vld [vmem:[%s865_s3] sm:$0xff]  ;;  %v45_v16 = vld [vmem:[%s862_s0 + $0x48] sm:$0xff]  ;;  %v43_v20 = vld [vmem:[%s862_s0 + $0x38] sm:$0xff]  ;;  %s454_s7 = sshll.u32 %s635_s6, 4  ;;  %s455_s7 = int_to_ptr.vmem [resolvable:$true] %s454_s7 }
  0x10   :  { %533 = vmatprep.subr.msk.mxu0 %vm92_vm0, %v47_v10  ;;  %v26_v17 = vld [vmem:[%s865_s3 + $0x40] sm:$0xff]  ;;  %v27_v18 = vld [vmem:[%s865_s3 + $0x48] sm:$0xff]  ;;  %v42_v21 = vld [vmem:[%s862_s0 + $0x30] sm:$0xff]  ;;  %p616_p1 = scmp.lt.s32.totalorder %s455_s7, %s455_s7 }
  0x11   :  { %69 = vperm.xlu0 %593, %v21_v11   ;;  %64 = vperm.xlu1 %594, %v20_v12   ;;  %v44_v19 = vld [vmem:[%s862_s0 + $0x40] sm:$0xff]  ;;  %v41_v22 = vld [vmem:[%s862_s0 + $0x28] sm:$0xff]  ;;  %v39_v24 = vld [vmem:[%s862_s0 + $0x18] sm:$0xff] }
  0x12   :  { %v40_v23 = vld [vmem:[%s862_s0 + $0x20] sm:$0xff]  ;;  %v38_v25 = vld [vmem:[%s862_s0 + $0x10] sm:$0xff]  ;;  %v37_v26 = vld [vmem:[%s862_s0 + $0x8] sm:$0xff] }
  0x13   :  { %534 = vmatpush3.xpose.msk.msra.mxu0 %vm92_vm0, %v47_v10  ;;  %v36_v27 = vld [vmem:[%s862_s0] sm:$0xff]  ;;  %v29_v28 = vld [vmem:[%s863_s1 + $0x8] sm:$0xff]  ;;  %v30_v29 = vld [vmem:[%s863_s1 + $0x10] sm:$0xff] }
  0x14   :  { %535 = vmatprep.subr.msk.mxu0 %vm92_vm0, %v46_v13  ;;  %v31_v30 = vld [vmem:[%s863_s1 + $0x18] sm:$0xff]  ;;  %v32_v31 = vld [vmem:[%s863_s1 + $0x20] sm:$0xff]  ;;  %v33_v32 = vld [vmem:[%s863_s1 + $0x28] sm:$0xff] }
  0x15   :  { %59 = vperm.xlu0 %593, %v19_v14   ;;  %54 = vperm.xlu1 %594, %v18_v15   ;;  %v34_v33 = vld [vmem:[%s863_s1 + $0x30] sm:$0xff]  ;;  %v35_v34 = vld [vmem:[%s863_s1 + $0x38] sm:$0xff]  ;;  %v342_v35 = vld [vmem:[%s864_s2] sm:$0xff] }
  0x16   :  { %585 = vmatprep.mubr.msk.f32.mxu1 %vm354_vm1, %v342_v35 }
  0x17   :  { %536 = vmatpush3.xpose.msk.msra.mxu0 %vm92_vm0, %v46_v13 }
  0x18   :  { %537 = vmatprep.subr.msk.mxu0 %vm92_vm0, %v45_v16 }
  0x19   :  { %346 = vperm.xlu0 %593, %v26_v17   ;;  %351 = vperm.xlu1 %594, %v27_v18  }
  0x1b   :  { %538 = vmatpush3.xpose.msk.msra.mxu0 %vm92_vm0, %v45_v16 }
  0x1c   :  { %539 = vmatprep.subr.msk.mxu0 %vm92_vm0, %v44_v19 }
  0x1f   :  { %540 = vmatpush3.xpose.msk.msra.mxu0 %vm92_vm0, %v44_v19 }
  0x20   :  { %541 = vmatprep.subr.msk.mxu0 %vm92_vm0, %v43_v20 }
  0x23   :  { %542 = vmatpush3.xpose.msk.msra.mxu0 %vm92_vm0, %v43_v20 }
  0x24   :  { %543 = vmatprep.subr.msk.mxu0 %vm92_vm0, %v42_v21 }
  0x27   :  { %544 = vmatpush3.xpose.msk.msra.mxu0 %vm92_vm0, %v42_v21 }
  0x28   :  { %545 = vmatprep.subr.msk.mxu0 %vm92_vm0, %v41_v22 }
  0x2b   :  { %546 = vmatpush3.xpose.msk.msra.mxu0 %vm92_vm0, %v41_v22 }
  0x2c   :  { %547 = vmatprep.subr.msk.mxu0 %vm92_vm0, %v40_v23 }
  0x2f   :  { %548 = vmatpush3.xpose.msk.msra.mxu0 %vm92_vm0, %v40_v23 }
  0x30   :  { %549 = vmatprep.subr.msk.mxu0 %vm92_vm0, %v39_v24 }
  0x33   :  { %550 = vmatpush3.xpose.msk.msra.mxu0 %vm92_vm0, %v39_v24 }
  0x34   :  { %551 = vmatprep.subr.msk.mxu0 %vm92_vm0, %v38_v25 }
  0x37   :  { %552 = vmatpush3.xpose.msk.msra.mxu0 %vm92_vm0, %v38_v25 }
  0x38   :  { %553 = vmatprep.subr.msk.mxu0 %vm92_vm0, %v37_v26 }
  0x3b   :  { %554 = vmatpush3.xpose.msk.msra.mxu0 %vm92_vm0, %v37_v26 }
  0x3c   :  { %555 = vmatprep.subr.msk.mxu0 %vm92_vm0, %v36_v27 }
  0x3f   :  { %556 = vmatpush3.xpose.msk.msra.mxu0 %vm92_vm0, %v36_v27 }
  0x42   :  { %558 = vmatmul.mubr.msk.f32.vlgmr.msra.gmra.mxu0 %vm92_vm0, %v29_v28 }
  0x43   :  { %560 = vmatprep.mubr.msk.f32.mxu0 %vm92_vm0, %v30_v29 }
  0x46   :  { %561 = vmatmul.mubr.msk.f32.gmra.mxu0 %vm92_vm0, %v31_v30 }
  0x47   :  { %563 = vmatprep.mubr.msk.f32.mxu0 %vm92_vm0, %v32_v31 }
  0x4a   :  { %564 = vmatmul.mubr.msk.f32.gmra.mxu0 %vm92_vm0, %v33_v32 }
  0x4b   :  { %566 = vmatprep.mubr.msk.f32.mxu0 %vm92_vm0, %v34_v33 }
  0x4e   :  { %567 = vmatmul.mubr.msk.f32.gmra.mxu0 %vm92_vm0, %v35_v34 }
  0x7f   :  { %v90_v36 = vpop.permute.xlu0 %89 }
  0x80   :  { %v80_v37 = vpop.permute.xlu1 %79 }
  0x88   :  { %v85_v38 = vpop.permute.xlu0 %84  ;;  %v75_v39 = vpop.permute.xlu1 %74 }
  0x8c   :  { %v70_v40 = vpop.permute.xlu0 %69  ;;  %v65_v41 = vpop.permute.xlu1 %64 }
  0x90   :  { %v60_v44 = vpop.permute.xlu0 %59  ;;  %v55_v47 = vpop.permute.xlu1 %54 }
 0x102   :  { %v559_v42 = vpop.f32.mrf.mxu0 }
 0x103   :  { %v811_v49 = vadd.f32 %v559_v42, %v60_v44 }
 0x104   :  { %v231_v43 = vpop.f32.mrf.mxu0 }
 0x105   :  { %v817_v53 = vadd.f32 %v231_v43, %v55_v47  ;;  %v271_v57 = vmul.f32 %v811_v49, %v811_v49 }
 0x106   :  { %v562_v45 = vpop.f32.mrf.mxu0 }
 0x107   :  { %v809_v46 = vadd.f32 %v562_v45, %v70_v40  ;;  %v270_v62 = vmul.f32 %v817_v53, %v817_v53  ;;  %v279_v4 = vmul.f32 %v271_v57, %v811_v49 }
 0x108   :  { %v241_v48 = vpop.f32.mrf.mxu0 }
 0x109   :  { %v813_v50 = vadd.f32 %v241_v48, %v65_v41  ;;  %v273_v51 = vmul.f32 %v809_v46, %v809_v46  ;;  %v278_v10 = vmul.f32 %v270_v62, %v817_v53  ;;  %v287_v16 = vmul.f32 0.044715, %v279_v4 }
 0x10a   :  { %v565_v52 = vpop.f32.mrf.mxu0 }
 0x10b   :  { %v272_v54 = vmul.f32 %v813_v50, %v813_v50  ;;  %v821_v55 = vadd.f32 %v565_v52, %v80_v37  ;;  %v281_v58 = vmul.f32 %v273_v51, %v809_v46  ;;  %v286_v23 = vmul.f32 0.044715, %v278_v10  ;;  %v347_v10 = vpop.permute.xlu0 %346 }
 0x10c   :  { %v251_v56 = vpop.f32.mrf.mxu0  ;;  %v295_v28 = vadd.f32 %v287_v16, %v811_v49 }
 0x10d   :  { %v275_v59 = vmul.f32 %v821_v55, %v821_v55  ;;  %v828_v60 = vadd.f32 %v251_v56, %v75_v39  ;;  %v280_v63 = vmul.f32 %v272_v54, %v813_v50  ;;  %v289_v6 = vmul.f32 0.044715, %v281_v58 }
 0x10e   :  { %v568_v61 = vpop.f32.mrf.mxu0  ;;  %v294_v32 = vadd.f32 %v286_v23, %v817_v53  ;;  %v303_v34 = vmul.f32 0.7978846, %v295_v28 }
 0x10f   :  { %v283_v0 = vmul.f32 %v275_v59, %v821_v55  ;;  %v274_v1 = vmul.f32 %v828_v60, %v828_v60  ;;  %v267_v2 = vadd.f32 %v568_v61, %v90_v36  ;;  %v288_v12 = vmul.f32 0.044715, %v280_v63 }
 0x110   :  { %v261_v3 = vpop.f32.mrf.mxu0  ;;  %v297_v18 = vadd.f32 %v289_v6, %v809_v46  ;;  %v302_v35 = vmul.f32 0.7978846, %v294_v32 }
 0x111   :  { %v262_v5 = vadd.f32 %v261_v3, %v85_v38  ;;  %v291_v7 = vmul.f32 0.044715, %v283_v0  ;;  %v282_v8 = vmul.f32 %v274_v1, %v828_v60  ;;  %v277_v9 = vmul.f32 %v267_v2, %v267_v2 }
 0x112   :  { %v296_v24 = vadd.f32 %v288_v12, %v813_v50  ;;  %v305_v29 = vmul.f32 0.7978846, %v297_v18 }
 0x113   :  { %v276_v11 = vmul.f32 %v262_v5, %v262_v5  ;;  %v299_v13 = vadd.f32 %v291_v7, %v821_v55  ;;  %v290_v14 = vmul.f32 0.044715, %v282_v8  ;;  %v285_v15 = vmul.f32 %v277_v9, %v267_v2  ;;  %v343_v8 = vld [vmem:[%s864_s2 + $0x8] sm:$0xff]  ;;  %s611_s2 = scalar_lea.vmem %s455_s7, 512 }
 0x114   :  { %v304_v33 = vmul.f32 0.7978846, %v296_v24  ;;  %p612_p0 = scmp.ne.s32.totalorder %s455_s7, %s611_s2  ;;  %p617_p2 = scmp.lt.s32.totalorder %s611_s2, %s611_s2 }
 0x115   :  { %v284_v17 = vmul.f32 %v276_v11, %v262_v5  ;;  %v307_v19 = vmul.f32 0.7978846, %v299_v13  ;;  %v298_v20 = vadd.f32 %v290_v14, %v828_v60  ;;  %v293_v21 = vmul.f32 0.044715, %v285_v15 }
 0x116   :  { %p618_p3 = por %p617_p2, %p616_p1 }
 0x117   :  { %v292_v22 = vmul.f32 0.044715, %v284_v17  ;;  %v306_v25 = vmul.f32 0.7978846, %v298_v20  ;;  %v301_v26 = vadd.f32 %v293_v21, %v267_v2  ;;  %595 = vtanh.f32 %v307_v19 }
 0x118   :  { %p619_p4 = pnand %p618_p3, %p612_p0 }
 0x119   :  { %v300_v27 = vadd.f32 %v292_v22, %v262_v5  ;;  %v309_v30 = vmul.f32 0.7978846, %v301_v26  ;;  %597 = vtanh.f32 %v306_v25 }
 0x11b   :  { %v308_v31 = vmul.f32 0.7978846, %v300_v27  ;;  %599 = vtanh.f32 %v309_v30 }
 0x11d   :  { %601 = vtanh.f32 %v308_v31 }
 0x11e   :  { %603 = vtanh.f32 %v305_v29 }
 0x11f   :  { %605 = vtanh.f32 %v304_v33 }
 0x120   :  { %607 = vtanh.f32 %v303_v34 }
 0x121   :  { %609 = vtanh.f32 %v302_v35 }
 0x124   :  { %v596_v36 = vpop.eup %595 }
 0x125   :  { %v323_v41 = vadd.f32 1.0, %v596_v36 }
 0x126   :  { %v598_v37 = vpop.eup %597 }
 0x127   :  { %v322_v45 = vadd.f32 1.0, %v598_v37  ;;  %v331_v52 = vmul.f32 0.5, %v323_v41 }
 0x128   :  { %v600_v38 = vpop.eup %599 }
 0x129   :  { %v325_v40 = vadd.f32 1.0, %v600_v38  ;;  %v330_v58 = vmul.f32 0.5, %v322_v45  ;;  %v339_v62 = vmul.f32 %v331_v52, %v821_v55 }
 0x12a   :  { %v602_v39 = vpop.eup %601 }
 0x12b   :  { %v604_v42 = vpop.eup %603  ;;  %v324_v43 = vadd.f32 1.0, %v602_v39  ;;  %v333_v44 = vmul.f32 0.5, %v325_v40  ;;  %v338_v1 = vmul.f32 %v330_v58, %v828_v60 }
 0x12c   :  { %v606_v47 = vpop.eup %605  ;;  %v321_v54 = vadd.f32 1.0, %v604_v42 }
 0x12d   :  { %v332_v48 = vmul.f32 0.5, %v324_v43  ;;  %v341_v51 = vmul.f32 %v333_v44, %v267_v2  ;;  %v608_v56 = vpop.eup %607  ;;  %v320_v59 = vadd.f32 1.0, %v606_v47 }
 0x12e   :  { %v610_v61 = vpop.eup %609  ;;  %v329_v63 = vmul.f32 0.5, %v321_v54  ;;  %v319_v0 = vadd.f32 1.0, %v608_v56 }
 0x12f   :  { %v340_v57 = vmul.f32 %v332_v48, %v262_v5  ;;  %569 = vmatprep.subr.mxu1 %v341_v51  ;;  %v328_v3 = vmul.f32 0.5, %v320_v59  ;;  %v318_v2 = vadd.f32 1.0, %v610_v61 }
 0x130   :  { %570 = vmatpush3.msra.mxu1 %v341_v51  ;;  %v337_v4 = vmul.f32 %v329_v63, %v809_v46  ;;  %v327_v5 = vmul.f32 0.5, %v319_v0  ;;  %v352_v46 = vpop.permute.xlu1 %351 }
 0x131   :  { %571 = vmatprep.subr.mxu1 %v340_v57  ;;  %v336_v6 = vmul.f32 %v328_v3, %v813_v50  ;;  %v326_v7 = vmul.f32 0.5, %v318_v2 }
 0x132   :  { %572 = vmatpush3.msra.mxu1 %v340_v57  ;;  %v335_v55 = vmul.f32 %v327_v5, %v811_v49 }
 0x133   :  { %573 = vmatprep.subr.mxu1 %v339_v62  ;;  %v334_v60 = vmul.f32 %v326_v7, %v817_v53 }
 0x134   :  { %574 = vmatpush3.msra.mxu1 %v339_v62 }
 0x135   :  { %575 = vmatprep.subr.mxu1 %v338_v1 }
 0x136   :  { %576 = vmatpush3.msra.mxu1 %v338_v1 }
 0x137   :  { %577 = vmatprep.subr.mxu1 %v337_v4 }
 0x138   :  { %578 = vmatpush3.msra.mxu1 %v337_v4 }
 0x139   :  { %579 = vmatprep.subr.mxu1 %v336_v6 }
 0x13a   :  { %580 = vmatpush3.msra.mxu1 %v336_v6 }
 0x13b   :  { %581 = vmatprep.subr.mxu1 %v335_v55 }
 0x13c   :  { %582 = vmatpush3.msra.mxu1 %v335_v55 }
 0x13d   :  { %583 = vmatprep.subr.mxu1 %v334_v60 }
 0x13e   :  { %584 = vmatpush3.msra.mxu1 %v334_v60 }
 0x13f   :  { %586 = vmatmul.mubr.msk.f32.vlgmr.msra.gmra.mxu1 %vm354_vm1, %v343_v8 }
 0x1ff   :  { %v587_v50 = vpop.f32.mrf.mxu1 }
 0x200   :  { %v433_v9 = vadd.f32 %v587_v50, %v352_v46 }
 0x201   :  { %v427_v11 = vpop.f32.mrf.mxu1 }
 0x202   :  { %437 = vst.msk [vmem:[#allocation2 + $0x8] sm:$0xff] %vm354_vm1, %v433_v9  ;;  %v428_v49 = vadd.f32 %v427_v11, %v347_v10  ;;  %442 = vrot.lane.b32.xlu1 %v433_v9, %s634_s5 }
 0x204   :  { %436 = vst.msk [vmem:[#allocation2] sm:$0xff] %vm354_vm1, %v428_v49  ;;  %440 = vrot.lane.b32.xlu0 %v428_v49, %s634_s5 }
 0x274   :  { %v443_v53 = vpop.permute.xlu1 %442 }
 0x275   :  { %448 = vst.msk [vmem:[#allocation2 + $0x18] sm:$0xff] %vm354_vm1, %v443_v53 }
 0x276   :  { %v441_v12 = vpop.permute.xlu0 %440 }
 0x277   :  { %447 = vst.msk [vmem:[#allocation2 + $0x10] sm:$0xff] %vm354_vm1, %v441_v12 }
 0x278   :  { %622 = shalt.err (!%p619_p4)
}
 0x279   :  { %s636_s8 = smov 128   ;;  %s637_s9 = smov 8  }
 0x27a   :  { %460 = dma.vmem_to_hbm [thread:$0]  %s455_s7, 512, %s866_s4, [#allocation3], %s636_s8, %s636_s8, %s637_s9  }
 0x27b   :  { %631 = dma.done.wait [#allocation3], 512  }
 0x27c   :  { %632 = vsyncadd [#allocation3], 4294966784 }
 0x27d   :  { %464 = vsyncpa [#allocation3], 1 }

</bundles_post_ra>
